<compile_context>
chip_gen: v7x
topology: tpu7x:2x2x1
jax: 0.10.0
libtpu: 0.0.40
codegen_flags: <defaults>
</compile_context>

<pallas_src>
import functools
import math

import jax
import jax.numpy as jnp
from jax.experimental import pallas as pl
from jax.experimental.pallas import tpu as pltpu

LN_EPS = 1e-5                                  # PyTorch TransformerEncoderLayer layer_norm_eps
RMS_EPS = float(jnp.finfo(jnp.float32).eps)    # PyTorch RMSNorm(eps=None) default (float32)


# ----------------------------------------------------------------------------
# Kernel
# ----------------------------------------------------------------------------
def _layer_norm_f32(x, w, eps):
    # LayerNorm with weight, no bias (bias=False in the PyTorch layer). f32 math.
    mean = jnp.mean(x, axis=-1, keepdims=True)
    var = jnp.mean((x - mean) ** 2, axis=-1, keepdims=True)
    return (x - mean) * jax.lax.rsqrt(var + eps) * w


def fused_autoencoder_kernel(x_ref, pos_ref, lnw_ref, wqkv_ref, wo_ref,
                             w1_ref, w2_ref, enw_ref, o_ref, *,
                             n_heads, n_enc_layers):
    """One grid step = one transformer layer applied to one batch tile.

    The activation is kept in the revisited output block (resident in VMEM
    across the 'arbitrary' layer axis); per-layer weight slabs are streamed
    (and double-buffered) via layer-indexed BlockSpecs.
    """
    layer = pl.program_id(1)
    bt, S, D = o_ref.shape
    hd = D // n_heads
    R = bt * S

    # ---- prologue (first layer only): x + pos_embedding into resident block
    @pl.when(layer == 0)
    def _():
        o_ref[...] = x_ref[...] + pos_ref[...]

    x = o_ref[...].astype(jnp.float32).reshape(R, D)   # fold batch tile into rows

    ln_w = lnw_ref[0].astype(jnp.float32)              # (2, D): [ln1_w, ln2_w]
    wqkv = wqkv_ref[0]                                 # (D, 3D) pre-transposed, Q-scaled, bf16
    wo = wo_ref[0]                                     # (D, D)  pre-transposed
    w1 = w1_ref[0]                                     # (D, 4D) pre-transposed
    w2 = w2_ref[0]                                     # (4D, D) pre-transposed
    mm_dtype = wqkv.dtype                              # bf16 MXU operands (f32 accumulation)

    # ---- self-attention block (pre-norm) ----
    h = _layer_norm_f32(x, ln_w[0:1, :], LN_EPS)
    qkv = jnp.dot(h.astype(mm_dtype), wqkv,
                  preferred_element_type=jnp.float32)               # (R, 3D)

    # Lane-aligned Q/K/V slabs: offsets are multiples of D (choose D % 128 == 0
    # for lane-dense layouts), reshaped once outside the head loop.
    q = qkv[:, :D].reshape(bt, S, D).astype(mm_dtype)
    k = qkv[:, D:2 * D].reshape(bt, S, D).astype(mm_dtype)
    v = qkv[:, 2 * D:].reshape(bt, S, D).astype(mm_dtype)

    # Static, small head loop; each head is batched over the whole batch tile
    # (rank-3 contraction).  Attention scale already folded into W_qkv.
    # Heads' contexts are concatenated and the output projection is done as a
    # SINGLE full-K (R,D)@(D,D) matmul (no per-head out-proj matmuls).
    # For best MXU/lane utilisation prefer head_dim a multiple of 128.
    ctx_heads = []
    for hix in range(n_heads):
        lo = hix * hd
        qh = q[:, :, lo:lo + hd]
        kh = k[:, :, lo:lo + hd]
        vh = v[:, :, lo:lo + hd]
        s = jnp.einsum("bqd,bkd->bqk", qh, kh,
                       preferred_element_type=jnp.float32)          # (bt, S, S)
        s = s - jnp.max(s, axis=-1, keepdims=True)
        p = jnp.exp(s)
        p = p * pl.reciprocal(jnp.sum(p, axis=-1, keepdims=True), approx=True)
        ctx_heads.append(
            jnp.einsum("bqk,bkd->bqd", p.astype(mm_dtype), vh,
                       preferred_element_type=jnp.float32))          # (bt, S, hd)
    ctx = jnp.concatenate(ctx_heads, axis=-1).reshape(R, D)          # (R, D)
    attn = jnp.dot(ctx.astype(mm_dtype), wo,
                   preferred_element_type=jnp.float32)               # (R, D)
    x = x + attn

    # ---- feed-forward block (pre-norm) ----
    h2 = _layer_norm_f32(x, ln_w[1:2, :], LN_EPS)
    ff = jnp.dot(h2.astype(mm_dtype), w1, preferred_element_type=jnp.float32)  # (R, 4D)
    ff = jnp.maximum(ff, 0.0)                                                  # relu
    ff = jnp.dot(ff.astype(mm_dtype), w2, preferred_element_type=jnp.float32)  # (R, D)
    x = x + ff

    # ---- single store; encode RMSNorm fused on the encoder boundary ----
    is_boundary = layer == n_enc_layers - 1

    @pl.when(jnp.logical_not(is_boundary))
    def _():
        o_ref[...] = x.reshape(bt, S, D).astype(o_ref.dtype)

    @pl.when(is_boundary)
    def _():
        w = enw_ref[...].astype(jnp.float32)                # (1, D)
        ms = jnp.mean(x * x, axis=-1, keepdims=True)
        y = x * jax.lax.rsqrt(ms + RMS_EPS) * w
        o_ref[...] = y.reshape(bt, S, D).astype(o_ref.dtype)


# ----------------------------------------------------------------------------
# Host-side weight packing (stack per layer, pre-transpose, fold attn scale)
# ----------------------------------------------------------------------------
def pack_params(params, n_heads, weights_dtype=jnp.bfloat16):
    """Stack encoder+decoder layer weights along a leading layer axis,
    pre-transpose the matmul weights (kernel never transposes) and fold the
    1/sqrt(head_dim) attention scale into the Q columns of W_qkv.

    weights_dtype=bf16 (default) halves weight DMA + VMEM and uses the native
    bf16 MXU path on all TPU generations; use float32 for strict numerics."""
    layers = list(params["encoder"]) + list(params["decoder"])
    D = params["pos_embedding"].shape[-1]
    hd = D // n_heads
    scale = 1.0 / math.sqrt(hd)

    def stack_t(name):   # (NL, out, in) -> (NL, in, out)
        return jnp.transpose(jnp.stack([lp[name] for lp in layers], axis=0), (0, 2, 1))

    lnw = jnp.stack(
        [jnp.stack([lp["ln1_w"], lp["ln2_w"]], axis=0) for lp in layers], axis=0
    ).astype(jnp.float32)                                                  # (NL, 2, D)

    wqkv = stack_t("wqkv").astype(jnp.float32)                             # (NL, D, 3D)
    col_scale = jnp.concatenate(
        [jnp.full((D,), scale, jnp.float32), jnp.ones((2 * D,), jnp.float32)], axis=0)
    wqkv = wqkv * col_scale[None, None, :]   # fold attention scale into Q columns

    return {
        "pos": params["pos_embedding"].astype(jnp.float32),                # (1, S, D)
        "lnw": lnw,
        "wqkv": wqkv.astype(weights_dtype),                                # (NL, D, 3D)
        "wo": stack_t("wo").astype(weights_dtype),                         # (NL, D, D)
        "w1": stack_t("w1").astype(weights_dtype),                         # (NL, D, 4D)
        "w2": stack_t("w2").astype(weights_dtype),                         # (NL, 4D, D)
        "enw": params["encode_norm_w"].reshape(1, -1).astype(jnp.float32), # (1, D)
        "n_enc_layers": len(params["encoder"]),
    }


# ----------------------------------------------------------------------------
# Tile sizing / VMEM budgeting
# ----------------------------------------------------------------------------
def _per_row_act_bytes(S, D):
    # f32 bytes touched per batch row per layer step: x in (2x buf) + resident
    # out + qkv (3D) + ffn hidden (4D) + context copy (D) + one head's scores.
    return 4 * S * (2 * D + 2 * D + 3 * D + 4 * D + D + S)


def _default_batch_tile(B, S, D, weight_slab_bytes):
    """Largest batch tile whose activations fit a conservative (v7x-sized)
    VMEM budget after the double-buffered weight slab; then split so the
    'parallel' axis feeds both v7x TensorCores when B allows.
    On single-TC chips (v5e/v6e), pass batch_tile=B explicitly so the weight
    slab is streamed only once per layer."""
    vmem_budget = 64 * 1024 * 1024                       # v7x per-TC VMEM
    budget = max(vmem_budget - 2 * weight_slab_bytes - (8 << 20), 4 << 20)
    max_rows = max((budget // 2) // _per_row_act_bytes(S, D), 1)
    bt = 1
    for cand in range(1, B + 1):
        if B % cand == 0 and cand * S <= max_rows:
            bt = cand
    if bt == B and B % 2 == 0 and B >= 2:                # keep 2 parallel tiles for megacore
        bt = B // 2
    return bt


# ----------------------------------------------------------------------------
# Wrapper: single fused pallas_call
# ----------------------------------------------------------------------------
def transformer_autoencoder_forward(x, packed, n_heads, *, batch_tile=None):
    B, S, D = x.shape
    NL = packed["lnw"].shape[0]                 # total layers = n_enc + n_dec
    n_enc = packed["n_enc_layers"]
    assert NL >= 2 and D % n_heads == 0
    # For lane-dense layouts prefer D % 128 == 0 and batch_tile*S % 8 == 0
    # (pad the model config on the host if necessary).

    wbytes = packed["wqkv"].dtype.itemsize
    weight_slab = 12 * D * D * wbytes           # per-layer: wqkv + wo + w1 + w2

    if batch_tile is None:
        batch_tile = _default_batch_tile(B, S, D, weight_slab)
    assert B % batch_tile == 0
    nb = B // batch_tile

    # Explicit VMEM budget: 2x (double-buffered) weight slab + resident
    # activation + x double buffer + intermediates, with 2x headroom.
    act_bytes = batch_tile * _per_row_act_bytes(S, D) + 2 * S * D * 4
    vmem_limit = int(2 * (2 * weight_slab + act_bytes)) + (4 << 20)
    vmem_limit = min(max(vmem_limit, 32 << 20), 128 << 20)

    kernel = functools.partial(fused_autoencoder_kernel,
                               n_heads=n_heads, n_enc_layers=n_enc)

    return pl.pallas_call(
        kernel,
        out_shape=jax.ShapeDtypeStruct((B, S, D), x.dtype),
        grid=(nb, NL),
        in_specs=[
            pl.BlockSpec((batch_tile, S, D), lambda b, l: (b, 0, 0)),   # x
            pl.BlockSpec((1, S, D), lambda b, l: (0, 0, 0)),            # pos embedding
            pl.BlockSpec((1, 2, D), lambda b, l: (l, 0, 0)),            # ln1/ln2 weights
            pl.BlockSpec((1, D, 3 * D), lambda b, l: (l, 0, 0)),        # W_qkv^T (Q-scaled)
            pl.BlockSpec((1, D, D), lambda b, l: (l, 0, 0)),            # W_out^T
            pl.BlockSpec((1, D, 4 * D), lambda b, l: (l, 0, 0)),        # W_ffn1^T
            pl.BlockSpec((1, 4 * D, D), lambda b, l: (l, 0, 0)),        # W_ffn2^T
            pl.BlockSpec((1, D), lambda b, l: (0, 0)),                  # encode RMSNorm weight
        ],
        out_specs=pl.BlockSpec((batch_tile, S, D), lambda b, l: (b, 0, 0)),
        compiler_params=pltpu.CompilerParams(
            dimension_semantics=("parallel", "arbitrary"),
            vmem_limit_bytes=vmem_limit),
    )(x, packed["pos"], packed["lnw"], packed["wqkv"], packed["wo"],
      packed["w1"], packed["w2"], packed["enw"])


# ----------------------------------------------------------------------------
# Deterministic parameter construction (PyTorch nn.Module layouts)
# ----------------------------------------------------------------------------
def init_params(key, n_dim, n_layers, seq_len):
    def layer_params(k):
        k1, k2, k3, k4 = jax.random.split(k, 4)
        std = 1.0 / math.sqrt(n_dim)
        return {
            "ln1_w": jnp.ones((n_dim,), jnp.float32),
            "wqkv": jax.random.normal(k1, (3 * n_dim, n_dim), jnp.float32) * std,   # in_proj_weight
            "wo": jax.random.normal(k2, (n_dim, n_dim), jnp.float32) * std,         # out_proj.weight
            "ln2_w": jnp.ones((n_dim,), jnp.float32),
            "w1": jax.random.normal(k3, (4 * n_dim, n_dim), jnp.float32) * std,     # linear1.weight
            "w2": jax.random.normal(k4, (n_dim, 4 * n_dim), jnp.float32)
                  * (1.0 / math.sqrt(4 * n_dim)),                                   # linear2.weight
        }

    kp, *lkeys = jax.random.split(key, 1 + 2 * n_layers)
    return {
        "pos_embedding": jax.random.normal(kp, (1, seq_len, n_dim), jnp.float32) * 0.02,
        "encoder": [layer_params(lkeys[i]) for i in range(n_layers)],
        "decoder": [layer_params(lkeys[n_layers + i]) for i in range(n_layers)],
        "encode_norm_w": jnp.ones((n_dim,), jnp.float32),
    }


# ----------------------------------------------------------------------------
if __name__ == "__main__":
    B, S, D, H, L = 2, 8, 32, 4, 2     # batch, seq_len, n_dim, n_heads, n_layers
    key = jax.random.PRNGKey(0)
    pkey, xkey = jax.random.split(key)

    params = init_params(pkey, D, L, S)
    # bf16 weights (default): native MXU path, half the weight DMA / VMEM.
    # Use weights_dtype=jnp.float32 for tight parity with the f32 PyTorch ref.
    packed = pack_params(params, n_heads=H, weights_dtype=jnp.bfloat16)
    x = jax.random.normal(xkey, (B, S, D), jnp.float32)

    out = transformer_autoencoder_forward(x, packed, H)
    out = jax.block_until_ready(out)
    assert out.shape == (B, S, D) and out.dtype == jnp.float32
    assert bool(jnp.all(jnp.isfinite(out)))
    print("KERNEL_OK")
</pallas_src>

<mosaic_0001>
module attributes {stable_mosaic.version = 11 : i64} {
  func.func @fused_autoencoder_kernel(%arg0: i32, %arg1: i32, %arg2: memref<1x8x32xf32, #tpu.memory_space<vmem>>, %arg3: memref<1x8x32xf32, #tpu.memory_space<vmem>>, %arg4: memref<1x2x32xf32, #tpu.memory_space<vmem>>, %arg5: memref<1x32x96xbf16, #tpu.memory_space<vmem>>, %arg6: memref<1x32x32xbf16, #tpu.memory_space<vmem>>, %arg7: memref<1x32x128xbf16, #tpu.memory_space<vmem>>, %arg8: memref<1x128x32xbf16, #tpu.memory_space<vmem>>, %arg9: memref<1x32xf32, #tpu.memory_space<vmem>>, %arg10: memref<1x8x32xf32, #tpu.memory_space<vmem>>) attributes {dimension_semantics = [#tpu.dimension_semantics<parallel>, #tpu.dimension_semantics<arbitrary>], iteration_bounds = array<i64: 2, 4>, scalar_prefetch = 0 : i64, scratch_operands = 0 : i64, tpu.core_type = #tpu.core_type<tc>, window_params = [{transform_indices = @transform_0, window_bounds = array<i64: 1, 8, 32>}, {pipeline_mode = #tpu.pipeline_mode<synchronous>, transform_indices = @transform_1, window_bounds = array<i64: 1, 8, 32>}, {transform_indices = @transform_2, window_bounds = array<i64: 1, 2, 32>}, {transform_indices = @transform_3, window_bounds = array<i64: 1, 32, 96>}, {transform_indices = @transform_4, window_bounds = array<i64: 1, 32, 32>}, {transform_indices = @transform_5, window_bounds = array<i64: 1, 32, 128>}, {transform_indices = @transform_6, window_bounds = array<i64: 1, 128, 32>}, {pipeline_mode = #tpu.pipeline_mode<synchronous>, transform_indices = @transform_7, window_bounds = array<i64: 1, 32>}, {transform_indices = @transform_8, window_bounds = array<i64: 1, 8, 32>}]} {
    %c0_i32 = arith.constant 0 : i32
    %0 = arith.cmpi eq, %arg1, %c0_i32 : i32
    %1 = arith.extui %0 : i1 to i32
    %c0_i32_0 = arith.constant 0 : i32
    %2 = arith.cmpi ne, %1, %c0_i32_0 : i32
    scf.if %2 {
      %c0_50 = arith.constant 0 : index
      %c0_51 = arith.constant 0 : index
      %c0_52 = arith.constant 0 : index
      %150 = vector.load %arg2[%c0_50, %c0_51, %c0_52] : memref<1x8x32xf32, #tpu.memory_space<vmem>>, vector<1x8x32xf32>
      %c0_53 = arith.constant 0 : index
      %c0_54 = arith.constant 0 : index
      %c0_55 = arith.constant 0 : index
      %151 = vector.load %arg3[%c0_53, %c0_54, %c0_55] : memref<1x8x32xf32, #tpu.memory_space<vmem>>, vector<1x8x32xf32>
      %152 = arith.addf %150, %151 : vector<1x8x32xf32>
      %c0_56 = arith.constant 0 : index
      %c0_57 = arith.constant 0 : index
      %c0_58 = arith.constant 0 : index
      %153 = vector.load %arg10[%c0_56, %c0_57, %c0_58] : memref<1x8x32xf32, #tpu.memory_space<vmem>>, vector<1x8x32xf32>
      tpu.vector_store %arg10[%c0_56, %c0_57, %c0_58], %152 {strides = array<i32>} : memref<1x8x32xf32, #tpu.memory_space<vmem>>, vector<1x8x32xf32>,
    } else {
    }
    %c0 = arith.constant 0 : index
    %c0_1 = arith.constant 0 : index
    %c0_2 = arith.constant 0 : index
    %3 = vector.load %arg10[%c0, %c0_1, %c0_2] : memref<1x8x32xf32, #tpu.memory_space<vmem>>, vector<1x8x32xf32>
    %4 = vector.shape_cast %3 : vector<1x8x32xf32> to vector<8x32xf32>
    %c0_3 = arith.constant 0 : index
    %c0_4 = arith.constant 0 : index
    %c0_5 = arith.constant 0 : index
    %5 = vector.load %arg4[%c0_3, %c0_4, %c0_5] : memref<1x2x32xf32, #tpu.memory_space<vmem>>, vector<1x2x32xf32>
    %6 = vector.shape_cast %5 : vector<1x2x32xf32> to vector<2x32xf32>
    %c0_6 = arith.constant 0 : index
    %c0_7 = arith.constant 0 : index
    %c0_8 = arith.constant 0 : index
    %7 = vector.load %arg5[%c0_6, %c0_7, %c0_8] : memref<1x32x96xbf16, #tpu.memory_space<vmem>>, vector<1x32x96xbf16>
    %8 = vector.shape_cast %7 : vector<1x32x96xbf16> to vector<32x96xbf16>
    %c0_9 = arith.constant 0 : index
    %c0_10 = arith.constant 0 : index
    %c0_11 = arith.constant 0 : index
    %9 = vector.load %arg6[%c0_9, %c0_10, %c0_11] : memref<1x32x32xbf16, #tpu.memory_space<vmem>>, vector<1x32x32xbf16>
    %10 = vector.shape_cast %9 : vector<1x32x32xbf16> to vector<32x32xbf16>
    %c0_12 = arith.constant 0 : index
    %c0_13 = arith.constant 0 : index
    %c0_14 = arith.constant 0 : index
    %11 = vector.load %arg7[%c0_12, %c0_13, %c0_14] : memref<1x32x128xbf16, #tpu.memory_space<vmem>>, vector<1x32x128xbf16>
    %12 = vector.shape_cast %11 : vector<1x32x128xbf16> to vector<32x128xbf16>
    %c0_15 = arith.constant 0 : index
    %c0_16 = arith.constant 0 : index
    %c0_17 = arith.constant 0 : index
    %13 = vector.load %arg8[%c0_15, %c0_16, %c0_17] : memref<1x128x32xbf16, #tpu.memory_space<vmem>>, vector<1x128x32xbf16>
    %14 = vector.shape_cast %13 : vector<1x128x32xbf16> to vector<128x32xbf16>
    %15 = vector.extract_strided_slice %6 {offsets = [0, 0], sizes = [1, 32], strides = [1, 1]} : vector<2x32xf32> to vector<1x32xf32>
    %cst = arith.constant dense<0.000000e+00> : vector<8xf32>
    %16 = vector.multi_reduction <add>, %4, %cst [1] : vector<8x32xf32> to vector<8xf32>
    %17 = vector.shape_cast %16 : vector<8xf32> to vector<8x1xf32>
    %cst_18 = arith.constant 3.200000e+01 : f32
    %18 = vector.broadcast %cst_18 : f32 to vector<8x1xf32>
    %19 = arith.divf %17, %18 : vector<8x1xf32>
    %20 = vector.broadcast %19 : vector<8x1xf32> to vector<8x32xf32>
    %21 = arith.subf %4, %20 : vector<8x32xf32>
    %22 = arith.mulf %21, %21 : vector<8x32xf32>
    %cst_19 = arith.constant dense<0.000000e+00> : vector<8xf32>
    %23 = vector.multi_reduction <add>, %22, %cst_19 [1] : vector<8x32xf32> to vector<8xf32>
    %24 = vector.shape_cast %23 : vector<8xf32> to vector<8x1xf32>
    %cst_20 = arith.constant 3.200000e+01 : f32
    %25 = vector.broadcast %cst_20 : f32 to vector<8x1xf32>
    %26 = arith.divf %24, %25 : vector<8x1xf32>
    %27 = vector.broadcast %19 : vector<8x1xf32> to vector<8x32xf32>
    %28 = arith.subf %4, %27 : vector<8x32xf32>
    %cst_21 = arith.constant 9.99999974E-6 : f32
    %29 = vector.broadcast %cst_21 : f32 to vector<8x1xf32>
    %30 = arith.addf %26, %29 : vector<8x1xf32>
    %31 = math.rsqrt %30 : vector<8x1xf32>
    %32 = vector.broadcast %31 : vector<8x1xf32> to vector<8x32xf32>
    %33 = arith.mulf %28, %32 : vector<8x32xf32>
    %34 = vector.broadcast %15 : vector<1x32xf32> to vector<8x32xf32>
    %35 = arith.mulf %33, %34 : vector<8x32xf32>
    %36 = arith.truncf %35 : vector<8x32xf32> to vector<8x32xbf16>
    %cst_22 = arith.constant dense<0.000000e+00> : vector<8x96xf32>
    %37 = tpu.matmul %36, %8, %cst_22 {dimension_numbers = #tpu.dot_dimension_numbers<[1], [0], [0], [1], [0, 0, 1, 1], [], []>} : vector<8x32xbf16>, vector<32x96xbf16>, vector<8x96xf32> -> vector<8x96xf32>
    %38 = vector.extract_strided_slice %37 {offsets = [0, 0], sizes = [8, 32], strides = [1, 1]} : vector<8x96xf32> to vector<8x32xf32>
    %39 = vector.shape_cast %38 : vector<8x32xf32> to vector<1x8x32xf32>
    %40 = arith.truncf %39 : vector<1x8x32xf32> to vector<1x8x32xbf16>
    %41 = vector.extract_strided_slice %37 {offsets = [0, 32], sizes = [8, 32], strides = [1, 1]} : vector<8x96xf32> to vector<8x32xf32>
    %42 = vector.shape_cast %41 : vector<8x32xf32> to vector<1x8x32xf32>
    %43 = arith.truncf %42 : vector<1x8x32xf32> to vector<1x8x32xbf16>
    %44 = vector.extract_strided_slice %37 {offsets = [0, 64], sizes = [8, 32], strides = [1, 1]} : vector<8x96xf32> to vector<8x32xf32>
    %45 = vector.shape_cast %44 : vector<8x32xf32> to vector<1x8x32xf32>
    %46 = arith.truncf %45 : vector<1x8x32xf32> to vector<1x8x32xbf16>
    %47 = vector.extract_strided_slice %40 {offsets = [0, 0, 0], sizes = [1, 8, 8], strides = [1, 1, 1]} : vector<1x8x32xbf16> to vector<1x8x8xbf16>
    %48 = vector.extract_strided_slice %43 {offsets = [0, 0, 0], sizes = [1, 8, 8], strides = [1, 1, 1]} : vector<1x8x32xbf16> to vector<1x8x8xbf16>
    %49 = vector.extract_strided_slice %46 {offsets = [0, 0, 0], sizes = [1, 8, 8], strides = [1, 1, 1]} : vector<1x8x32xbf16> to vector<1x8x8xbf16>
    "tpu.trace_start"() <{level = 10 : i32, message = "bqd,bkd->bqk"}> : () -> ()
    %cst_23 = arith.constant dense<0.000000e+00> : vector<1x8x8xf32>
    %50 = tpu.matmul %47, %48, %cst_23 {dimension_numbers = #tpu.dot_dimension_numbers<[2], [2], [1], [1], [0, 0, 0, 1, 1, 1], [0], [0]>} : vector<1x8x8xbf16>, vector<1x8x8xbf16>, vector<1x8x8xf32> -> vector<1x8x8xf32>
    "tpu.trace_stop"() : () -> ()
    %cst_24 = arith.constant dense<0xFF800000> : vector<1x8xf32>
    %51 = vector.multi_reduction <maximumf>, %50, %cst_24 [2] : vector<1x8x8xf32> to vector<1x8xf32>
    %52 = vector.shape_cast %51 : vector<1x8xf32> to vector<1x8x1xf32>
    %53 = vector.broadcast %52 : vector<1x8x1xf32> to vector<1x8x8xf32>
    %54 = arith.subf %50, %53 : vector<1x8x8xf32>
    %55 = math.exp %54 : vector<1x8x8xf32>
    %cst_25 = arith.constant dense<0.000000e+00> : vector<1x8xf32>
    %56 = vector.multi_reduction <add>, %55, %cst_25 [2] : vector<1x8x8xf32> to vector<1x8xf32>
    %57 = vector.shape_cast %56 : vector<1x8xf32> to vector<1x8x1xf32>
    %58 = tpu.reciprocal %57 {approx = true} : vector<1x8x1xf32> -> vector<1x8x1xf32>
    %59 = vector.broadcast %58 : vector<1x8x1xf32> to vector<1x8x8xf32>
    %60 = arith.mulf %55, %59 : vector<1x8x8xf32>
    %61 = arith.truncf %60 : vector<1x8x8xf32> to vector<1x8x8xbf16>
    "tpu.trace_start"() <{level = 10 : i32, message = "bqk,bkd->bqd"}> : () -> ()
    %cst_26 = arith.constant dense<0.000000e+00> : vector<1x8x8xf32>
    %62 = tpu.matmul %61, %49, %cst_26 {dimension_numbers = #tpu.dot_dimension_numbers<[2], [1], [1], [2], [0, 0, 0, 1, 1, 2], [0], [0]>} : vector<1x8x8xbf16>, vector<1x8x8xbf16>, vector<1x8x8xf32> -> vector<1x8x8xf32>
    "tpu.trace_stop"() : () -> ()
    %63 = vector.extract_strided_slice %40 {offsets = [0, 0, 8], sizes = [1, 8, 8], strides = [1, 1, 1]} : vector<1x8x32xbf16> to vector<1x8x8xbf16>
    %64 = vector.extract_strided_slice %43 {offsets = [0, 0, 8], sizes = [1, 8, 8], strides = [1, 1, 1]} : vector<1x8x32xbf16> to vector<1x8x8xbf16>
    %65 = vector.extract_strided_slice %46 {offsets = [0, 0, 8], sizes = [1, 8, 8], strides = [1, 1, 1]} : vector<1x8x32xbf16> to vector<1x8x8xbf16>
    "tpu.trace_start"() <{level = 10 : i32, message = "bqd,bkd->bqk"}> : () -> ()
    %cst_27 = arith.constant dense<0.000000e+00> : vector<1x8x8xf32>
    %66 = tpu.matmul %63, %64, %cst_27 {dimension_numbers = #tpu.dot_dimension_numbers<[2], [2], [1], [1], [0, 0, 0, 1, 1, 1], [0], [0]>} : vector<1x8x8xbf16>, vector<1x8x8xbf16>, vector<1x8x8xf32> -> vector<1x8x8xf32>
    "tpu.trace_stop"() : () -> ()
    %cst_28 = arith.constant dense<0xFF800000> : vector<1x8xf32>
    %67 = vector.multi_reduction <maximumf>, %66, %cst_28 [2] : vector<1x8x8xf32> to vector<1x8xf32>
    %68 = vector.shape_cast %67 : vector<1x8xf32> to vector<1x8x1xf32>
    %69 = vector.broadcast %68 : vector<1x8x1xf32> to vector<1x8x8xf32>
    %70 = arith.subf %66, %69 : vector<1x8x8xf32>
    %71 = math.exp %70 : vector<1x8x8xf32>
    %cst_29 = arith.constant dense<0.000000e+00> : vector<1x8xf32>
    %72 = vector.multi_reduction <add>, %71, %cst_29 [2] : vector<1x8x8xf32> to vector<1x8xf32>
    %73 = vector.shape_cast %72 : vector<1x8xf32> to vector<1x8x1xf32>
    %74 = tpu.reciprocal %73 {approx = true} : vector<1x8x1xf32> -> vector<1x8x1xf32>
    %75 = vector.broadcast %74 : vector<1x8x1xf32> to vector<1x8x8xf32>
    %76 = arith.mulf %71, %75 : vector<1x8x8xf32>
    %77 = arith.truncf %76 : vector<1x8x8xf32> to vector<1x8x8xbf16>
    "tpu.trace_start"() <{level = 10 : i32, message = "bqk,bkd->bqd"}> : () -> ()
    %cst_30 = arith.constant dense<0.000000e+00> : vector<1x8x8xf32>
    %78 = tpu.matmul %77, %65, %cst_30 {dimension_numbers = #tpu.dot_dimension_numbers<[2], [1], [1], [2], [0, 0, 0, 1, 1, 2], [0], [0]>} : vector<1x8x8xbf16>, vector<1x8x8xbf16>, vector<1x8x8xf32> -> vector<1x8x8xf32>
    "tpu.trace_stop"() : () -> ()
    %79 = vector.extract_strided_slice %40 {offsets = [0, 0, 16], sizes = [1, 8, 8], strides = [1, 1, 1]} : vector<1x8x32xbf16> to vector<1x8x8xbf16>
    %80 = vector.extract_strided_slice %43 {offsets = [0, 0, 16], sizes = [1, 8, 8], strides = [1, 1, 1]} : vector<1x8x32xbf16> to vector<1x8x8xbf16>
    %81 = vector.extract_strided_slice %46 {offsets = [0, 0, 16], sizes = [1, 8, 8], strides = [1, 1, 1]} : vector<1x8x32xbf16> to vector<1x8x8xbf16>
    "tpu.trace_start"() <{level = 10 : i32, message = "bqd,bkd->bqk"}> : () -> ()
    %cst_31 = arith.constant dense<0.000000e+00> : vector<1x8x8xf32>
    %82 = tpu.matmul %79, %80, %cst_31 {dimension_numbers = #tpu.dot_dimension_numbers<[2], [2], [1], [1], [0, 0, 0, 1, 1, 1], [0], [0]>} : vector<1x8x8xbf16>, vector<1x8x8xbf16>, vector<1x8x8xf32> -> vector<1x8x8xf32>
    "tpu.trace_stop"() : () -> ()
    %cst_32 = arith.constant dense<0xFF800000> : vector<1x8xf32>
    %83 = vector.multi_reduction <maximumf>, %82, %cst_32 [2] : vector<1x8x8xf32> to vector<1x8xf32>
    %84 = vector.shape_cast %83 : vector<1x8xf32> to vector<1x8x1xf32>
    %85 = vector.broadcast %84 : vector<1x8x1xf32> to vector<1x8x8xf32>
    %86 = arith.subf %82, %85 : vector<1x8x8xf32>
    %87 = math.exp %86 : vector<1x8x8xf32>
    %cst_33 = arith.constant dense<0.000000e+00> : vector<1x8xf32>
    %88 = vector.multi_reduction <add>, %87, %cst_33 [2] : vector<1x8x8xf32> to vector<1x8xf32>
    %89 = vector.shape_cast %88 : vector<1x8xf32> to vector<1x8x1xf32>
    %90 = tpu.reciprocal %89 {approx = true} : vector<1x8x1xf32> -> vector<1x8x1xf32>
    %91 = vector.broadcast %90 : vector<1x8x1xf32> to vector<1x8x8xf32>
    %92 = arith.mulf %87, %91 : vector<1x8x8xf32>
    %93 = arith.truncf %92 : vector<1x8x8xf32> to vector<1x8x8xbf16>
    "tpu.trace_start"() <{level = 10 : i32, message = "bqk,bkd->bqd"}> : () -> ()
    %cst_34 = arith.constant dense<0.000000e+00> : vector<1x8x8xf32>
    %94 = tpu.matmul %93, %81, %cst_34 {dimension_numbers = #tpu.dot_dimension_numbers<[2], [1], [1], [2], [0, 0, 0, 1, 1, 2], [0], [0]>} : vector<1x8x8xbf16>, vector<1x8x8xbf16>, vector<1x8x8xf32> -> vector<1x8x8xf32>
    "tpu.trace_stop"() : () -> ()
    %95 = vector.extract_strided_slice %40 {offsets = [0, 0, 24], sizes = [1, 8, 8], strides = [1, 1, 1]} : vector<1x8x32xbf16> to vector<1x8x8xbf16>
    %96 = vector.extract_strided_slice %43 {offsets = [0, 0, 24], sizes = [1, 8, 8], strides = [1, 1, 1]} : vector<1x8x32xbf16> to vector<1x8x8xbf16>
    %97 = vector.extract_strided_slice %46 {offsets = [0, 0, 24], sizes = [1, 8, 8], strides = [1, 1, 1]} : vector<1x8x32xbf16> to vector<1x8x8xbf16>
    "tpu.trace_start"() <{level = 10 : i32, message = "bqd,bkd->bqk"}> : () -> ()
    %cst_35 = arith.constant dense<0.000000e+00> : vector<1x8x8xf32>
    %98 = tpu.matmul %95, %96, %cst_35 {dimension_numbers = #tpu.dot_dimension_numbers<[2], [2], [1], [1], [0, 0, 0, 1, 1, 1], [0], [0]>} : vector<1x8x8xbf16>, vector<1x8x8xbf16>, vector<1x8x8xf32> -> vector<1x8x8xf32>
    "tpu.trace_stop"() : () -> ()
    %cst_36 = arith.constant dense<0xFF800000> : vector<1x8xf32>
    %99 = vector.multi_reduction <maximumf>, %98, %cst_36 [2] : vector<1x8x8xf32> to vector<1x8xf32>
    %100 = vector.shape_cast %99 : vector<1x8xf32> to vector<1x8x1xf32>
    %101 = vector.broadcast %100 : vector<1x8x1xf32> to vector<1x8x8xf32>
    %102 = arith.subf %98, %101 : vector<1x8x8xf32>
    %103 = math.exp %102 : vector<1x8x8xf32>
    %cst_37 = arith.constant dense<0.000000e+00> : vector<1x8xf32>
    %104 = vector.multi_reduction <add>, %103, %cst_37 [2] : vector<1x8x8xf32> to vector<1x8xf32>
    %105 = vector.shape_cast %104 : vector<1x8xf32> to vector<1x8x1xf32>
    %106 = tpu.reciprocal %105 {approx = true} : vector<1x8x1xf32> -> vector<1x8x1xf32>
    %107 = vector.broadcast %106 : vector<1x8x1xf32> to vector<1x8x8xf32>
    %108 = arith.mulf %103, %107 : vector<1x8x8xf32>
    %109 = arith.truncf %108 : vector<1x8x8xf32> to vector<1x8x8xbf16>
    "tpu.trace_start"() <{level = 10 : i32, message = "bqk,bkd->bqd"}> : () -> ()
    %cst_38 = arith.constant dense<0.000000e+00> : vector<1x8x8xf32>
    %110 = tpu.matmul %109, %97, %cst_38 {dimension_numbers = #tpu.dot_dimension_numbers<[2], [1], [1], [2], [0, 0, 0, 1, 1, 2], [0], [0]>} : vector<1x8x8xbf16>, vector<1x8x8xbf16>, vector<1x8x8xf32> -> vector<1x8x8xf32>
    "tpu.trace_stop"() : () -> ()
    %111 = tpu.concatenate %62, %78, %94, %110 in 2 : vector<1x8x8xf32>, vector<1x8x8xf32>, vector<1x8x8xf32>, vector<1x8x8xf32> -> vector<1x8x32xf32>
    %112 = vector.shape_cast %111 : vector<1x8x32xf32> to vector<8x32xf32>
    %113 = arith.truncf %112 : vector<8x32xf32> to vector<8x32xbf16>
    %cst_39 = arith.constant dense<0.000000e+00> : vector<8x32xf32>
    %114 = tpu.matmul %113, %10, %cst_39 {dimension_numbers = #tpu.dot_dimension_numbers<[1], [0], [0], [1], [0, 0, 1, 1], [], []>} : vector<8x32xbf16>, vector<32x32xbf16>, vector<8x32xf32> -> vector<8x32xf32>
    %115 = arith.addf %4, %114 : vector<8x32xf32>
    %116 = vector.extract_strided_slice %6 {offsets = [1, 0], sizes = [1, 32], strides = [1, 1]} : vector<2x32xf32> to vector<1x32xf32>
    %cst_40 = arith.constant dense<0.000000e+00> : vector<8xf32>
    %117 = vector.multi_reduction <add>, %115, %cst_40 [1] : vector<8x32xf32> to vector<8xf32>
    %118 = vector.shape_cast %117 : vector<8xf32> to vector<8x1xf32>
    %cst_41 = arith.constant 3.200000e+01 : f32
    %119 = vector.broadcast %cst_41 : f32 to vector<8x1xf32>
    %120 = arith.divf %118, %119 : vector<8x1xf32>
    %121 = vector.broadcast %120 : vector<8x1xf32> to vector<8x32xf32>
    %122 = arith.subf %115, %121 : vector<8x32xf32>
    %123 = arith.mulf %122, %122 : vector<8x32xf32>
    %cst_42 = arith.constant dense<0.000000e+00> : vector<8xf32>
    %124 = vector.multi_reduction <add>, %123, %cst_42 [1] : vector<8x32xf32> to vector<8xf32>
    %125 = vector.shape_cast %124 : vector<8xf32> to vector<8x1xf32>
    %cst_43 = arith.constant 3.200000e+01 : f32
    %126 = vector.broadcast %cst_43 : f32 to vector<8x1xf32>
    %127 = arith.divf %125, %126 : vector<8x1xf32>
    %128 = vector.broadcast %120 : vector<8x1xf32> to vector<8x32xf32>
    %129 = arith.subf %115, %128 : vector<8x32xf32>
    %cst_44 = arith.constant 9.99999974E-6 : f32
    %130 = vector.broadcast %cst_44 : f32 to vector<8x1xf32>
    %131 = arith.addf %127, %130 : vector<8x1xf32>
    %132 = math.rsqrt %131 : vector<8x1xf32>
    %133 = vector.broadcast %132 : vector<8x1xf32> to vector<8x32xf32>
    %134 = arith.mulf %129, %133 : vector<8x32xf32>
    %135 = vector.broadcast %116 : vector<1x32xf32> to vector<8x32xf32>
    %136 = arith.mulf %134, %135 : vector<8x32xf32>
    %137 = arith.truncf %136 : vector<8x32xf32> to vector<8x32xbf16>
    %cst_45 = arith.constant dense<0.000000e+00> : vector<8x128xf32>
    %138 = tpu.matmul %137, %12, %cst_45 {dimension_numbers = #tpu.dot_dimension_numbers<[1], [0], [0], [1], [0, 0, 1, 1], [], []>} : vector<8x32xbf16>, vector<32x128xbf16>, vector<8x128xf32> -> vector<8x128xf32>
    %cst_46 = arith.constant 0.000000e+00 : f32
    %139 = vector.broadcast %cst_46 : f32 to vector<8x128xf32>
    %140 = arith.maximumf %138, %139 : vector<8x128xf32>
    %141 = arith.truncf %140 : vector<8x128xf32> to vector<8x128xbf16>
    %cst_47 = arith.constant dense<0.000000e+00> : vector<8x32xf32>
    %142 = tpu.matmul %141, %14, %cst_47 {dimension_numbers = #tpu.dot_dimension_numbers<[1], [0], [0], [1], [0, 0, 1, 1], [], []>} : vector<8x128xbf16>, vector<128x32xbf16>, vector<8x32xf32> -> vector<8x32xf32>
    %143 = arith.addf %115, %142 : vector<8x32xf32>
    %c1_i32 = arith.constant 1 : i32
    %144 = arith.cmpi eq, %arg1, %c1_i32 : i32
    %true = arith.constant true
    %145 = arith.xori %144, %true : i1
    %146 = arith.extui %145 : i1 to i32
    %c0_i32_48 = arith.constant 0 : i32
    %147 = arith.cmpi ne, %146, %c0_i32_48 : i32
    scf.if %147 {
      %150 = vector.shape_cast %143 : vector<8x32xf32> to vector<1x8x32xf32>
      %c0_50 = arith.constant 0 : index
      %c0_51 = arith.constant 0 : index
      %c0_52 = arith.constant 0 : index
      %151 = vector.load %arg10[%c0_50, %c0_51, %c0_52] : memref<1x8x32xf32, #tpu.memory_space<vmem>>, vector<1x8x32xf32>
      tpu.vector_store %arg10[%c0_50, %c0_51, %c0_52], %150 {strides = array<i32>} : memref<1x8x32xf32, #tpu.memory_space<vmem>>, vector<1x8x32xf32>,
    } else {
    }
    %148 = arith.extui %144 : i1 to i32
    %c0_i32_49 = arith.constant 0 : i32
    %149 = arith.cmpi ne, %148, %c0_i32_49 : i32
    scf.if %149 {
      %c0_50 = arith.constant 0 : index
      %c0_51 = arith.constant 0 : index
      %150 = vector.load %arg9[%c0_50, %c0_51] : memref<1x32xf32, #tpu.memory_space<vmem>>, vector<1x32xf32>
      %151 = arith.mulf %143, %143 : vector<8x32xf32>
      %cst_52 = arith.constant dense<0.000000e+00> : vector<8xf32>
      %152 = vector.multi_reduction <add>, %151, %cst_52 [1] : vector<8x32xf32> to vector<8xf32>
      %153 = vector.shape_cast %152 : vector<8xf32> to vector<8x1xf32>
      %cst_53 = arith.constant 3.200000e+01 : f32
      %154 = vector.broadcast %cst_53 : f32 to vector<8x1xf32>
      %155 = arith.divf %153, %154 : vector<8x1xf32>
      %cst_54 = arith.constant 1.1920929E-7 : f32
      %156 = vector.broadcast %cst_54 : f32 to vector<8x1xf32>
      %157 = arith.addf %155, %156 : vector<8x1xf32>
      %158 = math.rsqrt %157 : vector<8x1xf32>
      %159 = vector.broadcast %158 : vector<8x1xf32> to vector<8x32xf32>
      %160 = arith.mulf %143, %159 : vector<8x32xf32>
      %161 = vector.broadcast %150 : vector<1x32xf32> to vector<8x32xf32>
      %162 = arith.mulf %160, %161 : vector<8x32xf32>
      %163 = vector.shape_cast %162 : vector<8x32xf32> to vector<1x8x32xf32>
      %c0_55 = arith.constant 0 : index
      %c0_56 = arith.constant 0 : index
      %c0_57 = arith.constant 0 : index
      %164 = vector.load %arg10[%c0_55, %c0_56, %c0_57] : memref<1x8x32xf32, #tpu.memory_space<vmem>>, vector<1x8x32xf32>
      tpu.vector_store %arg10[%c0_55, %c0_56, %c0_57], %163 {strides = array<i32>} : memref<1x8x32xf32, #tpu.memory_space<vmem>>, vector<1x8x32xf32>,
    } else {
    }
    return
  }
  func.func @transform_0(%arg0: i32, %arg1: i32) -> (i32, i32, i32) {
    %c0_i32 = arith.constant 0 : i32
    %c0_i32_0 = arith.constant 0 : i32
    %c0_i32_1 = arith.constant 0 : i32
    return %arg0, %c0_i32, %c0_i32_0 : i32, i32, i32
  }
  func.func @transform_1(%arg0: i32, %arg1: i32) -> (i32, i32, i32) {
    %c0_i32 = arith.constant 0 : i32
    %c0_i32_0 = arith.constant 0 : i32
    %c0_i32_1 = arith.constant 0 : i32
    %c0_i32_2 = arith.constant 0 : i32
    return %c0_i32, %c0_i32_0, %c0_i32_1 : i32, i32, i32
  }
  func.func @transform_2(%arg0: i32, %arg1: i32) -> (i32, i32, i32) {
    %c0_i32 = arith.constant 0 : i32
    %c0_i32_0 = arith.constant 0 : i32
    %c0_i32_1 = arith.constant 0 : i32
    return %arg1, %c0_i32, %c0_i32_0 : i32, i32, i32
  }
  func.func @transform_3(%arg0: i32, %arg1: i32) -> (i32, i32, i32) {
    %c0_i32 = arith.constant 0 : i32
    %c0_i32_0 = arith.constant 0 : i32
    %c0_i32_1 = arith.constant 0 : i32
    return %arg1, %c0_i32, %c0_i32_0 : i32, i32, i32
  }
  func.func @transform_4(%arg0: i32, %arg1: i32) -> (i32, i32, i32) {
    %c0_i32 = arith.constant 0 : i32
    %c0_i32_0 = arith.constant 0 : i32
    %c0_i32_1 = arith.constant 0 : i32
    return %arg1, %c0_i32, %c0_i32_0 : i32, i32, i32
  }
  func.func @transform_5(%arg0: i32, %arg1: i32) -> (i32, i32, i32) {
    %c0_i32 = arith.constant 0 : i32
    %c0_i32_0 = arith.constant 0 : i32
    %c0_i32_1 = arith.constant 0 : i32
    return %arg1, %c0_i32, %c0_i32_0 : i32, i32, i32
  }
  func.func @transform_6(%arg0: i32, %arg1: i32) -> (i32, i32, i32) {
    %c0_i32 = arith.constant 0 : i32
    %c0_i32_0 = arith.constant 0 : i32
    %c0_i32_1 = arith.constant 0 : i32
    return %arg1, %c0_i32, %c0_i32_0 : i32, i32, i32
  }
  func.func @transform_7(%arg0: i32, %arg1: i32) -> (i32, i32) {
    %c0_i32 = arith.constant 0 : i32
    %c0_i32_0 = arith.constant 0 : i32
    %c0_i32_1 = arith.constant 0 : i32
    return %c0_i32, %c0_i32_0 : i32, i32
  }
  func.func @transform_8(%arg0: i32, %arg1: i32) -> (i32, i32, i32) {
    %c0_i32 = arith.constant 0 : i32
    %c0_i32_0 = arith.constant 0 : i32
    %c0_i32_1 = arith.constant 0 : i32
    return %arg0, %c0_i32, %c0_i32_0 : i32, i32, i32
  }
}

</mosaic_0001>

<bundles_post_ra>
// kernel: tpu_custom_call.1
= control target key start
LH: loop header
LB: loop body
LE: loop exit
PB: predicated region body
PF: predicated region fallthrough
CT: control target
= control target key end

     0   :  { %s2124_s0 = inlined_call_operand.vmem [shape: f32[2,8,32], index: 0, kind: input, shape index: {}]   ;;  %s2125_s1 = inlined_call_operand.vmem [shape: f32[1,8,32], index: 1, kind: input, shape index: {}]   ;;  %s2126_s2 = inlined_call_operand.vmem [shape: f32[4,2,32], index: 2, kind: input, shape index: {}]   ;;  %s2127_s3 = inlined_call_operand.vmem [shape: bf16[4,32,96], index: 3, kind: input, shape index: {}]   ;;  %s2128_s4 = inlined_call_operand.vmem [shape: bf16[4,32,32], index: 4, kind: input, shape index: {}]   ;;  %s2129_s5 = inlined_call_operand.vmem [shape: bf16[4,32,128], index: 5, kind: input, shape index: {}]   ;;  %s2130_s6 = inlined_call_operand.vmem [shape: bf16[4,128,32], index: 6, kind: input, shape index: {}]   ;;  %s2131_s7 = inlined_call_operand.vmem [shape: f32[1,32], index: 7, kind: input, shape index: {}]   ;;  %s2132_s8 = inlined_call_operand.hbm [shape: f32[2,8,32], index: 8, kind: output, shape index: {}]  }
   0x1   :  { %2143 = sst [smem:[#allocation14_spill]] %s2132_s8 }
   0x2   :  { %13 = vsyncpa [#allocation3], 0 }
   0x3   :  { %15 = vsyncpa [#allocation3 + $0x1], 0  ;;  %s1837_s27 = smov 0   ;;  %s1839_s28 = smov 0  }
   0x4   :  { %s1841_s29 = smov 0   ;;  %s1843_s30 = smov 0  }
   0x5   :  { %s1845_s9 = smov 0   ;;  %s1847_s10 = smov 0  }
   0x6   :  { %s1849_s11 = smov 0   ;;  %s1851_s12 = smov 0  }
   0x7 LB: > { %2144 = sst [smem:[#allocation5_spill]] %s1745_s27  ;;  %s1377_s13 = sadd.s32 4294967295, %s1773_s12   ;;  %s1773_s12 = sphi %s1851_s12, %s21_s12   ;;  %s1769_s11 = sphi %s1849_s11, %s2165_s11   ;;  %s1765_s10 = sphi %s1847_s10, %s2164_s10   ;;  %s1761_s9 = sphi %s1845_s9, %s2163_s9   ;;  %s1757_s30 = sphi %s1843_s30, %s2162_s30   ;;  %s1753_s29 = sphi %s1841_s29, %s2168_s29   ;;  %s1749_s28 = sphi %s1839_s28, %s2167_s28   ;;  %s1745_s27 = sphi %s1837_s27, %s2166_s27  }
   0x8   : > { %2145 = sst [smem:[#allocation6_spill]] %s1753_s29  ;;  %s1378_s14 = sadd.s32 4294967294, %s1773_s12  }
   0x9   : > { %2146 = sst [smem:[#allocation7_spill]] %s1765_s10  ;;  %s30_s15 = sadd.s32 1, %s1765_s10 }
   0xa   : > { %2147 = sst [smem:[#allocation8_spill]] %s1769_s11  ;;  %p31_p0 = scmp.ge.s32.totalorder %s30_s15, 4 }
   0xb   : > { %2148 = sst [smem:[#allocation9_spill]] %s1773_s12  ;;  %s33_s16 = sadd.s32 1, %s1769_s11 }
   0xc   : > { %p248_p1 = scmp.ne.s32.totalorder %s1753_s29, %s1749_s28  ;;  %p249_p2 = scmp.eq.s32.totalorder %s1377_s13, 7 }
   0xd   : > { %s2170_s15 = smov (%p31_p0, %s30_s15), 0  ;;  %s2172_s16 = smov (!%p31_p0, %s33_s16), %s1769_s11 }
   0xe   : > { %2149 = sst [smem:[#allocation10_spill]] %s2170_s15  ;;  %p1886_p3 = por %p249_p2, %p248_p1 }
   0xf   : > { %p254_p4 = scmp.ne.s32.totalorder %s1749_s28, %s1745_s27  ;;  %p35_p5 = scmp.ge.s32.totalorder %s2172_s16, 2 }
  0x10   : > { %p255_p6 = scmp.eq.s32.totalorder %s1378_s14, 7  ;;  %p1381_p7 = scmp.ge.s32.totalorder %s1773_s12, 1 }
  0x11   : > { %p325_p8 = scmp.lt.s32.totalorder %s1773_s12, 9  ;;  %s2174_s16 = smov (%p35_p5, %s2172_s16), 0 }
  0x12   : > { %2151 = sst [smem:[#allocation11_spill]] %s2174_s16  ;;  %p1896_p9 = por %p255_p6, %p254_p4 }
  0x13   : > { %p326_p10 = pnand %p1381_p7, %p325_p8  ;;  %s235_s19 = ssub.s32 %s1769_s11, %s2174_s16 }
  0x14   : > { %s2152_s18 = scalar_select %p1896_p9, 1, 0 }
  0x15   : > { %s238_s20 = sadd.s32 1, %s1753_s29  ;;  %p236_p11 = scmp.eq.s32.totalorder %s235_s19, 0 }
  0x16   : > { %2153 = sst [smem:[#allocation12_spill]] %s2152_s18  ;;  %329 = sbr.rel (%p326_p10) target bundleno = 2764 (0xacc), region = 52 }
  0x17   : > { %s1904_s21 = scalar_select %p236_p11, %s1753_s29, %s238_s20  }
  0x18   : > { %s2138_s22 = sand.u32 (!%p326_p10), 1, %s1749_s28   ;;  %p382_p12 = scmp.lt.s32.totalorder (!%p326_p10), %s1761_s9, 1 }
  0x19   : > { %2154 = sst [smem:[#allocation13_spill]] %s1904_s21  ;;  %s1382_s23 = sshll.u32 (!%p326_p10), %s2138_s22, 3 }
  0x1a   : > { %p386_p13 = scmp.lt.s32.totalorder (!%p326_p10), %s1757_s30, 3  ;;  %p1393_p0 = scmp.ne.s32.totalorder (!%p326_p10), %s1757_s30, 0 }
  0x1d   : > { %s383_s24 = scalar_select %p382_p12, %s1761_s9, 1 }
  0x1e   : > { %s387_s25 = scalar_select %p386_p13, %s1757_s30, 3 }
  0x1f   : > { %s1383_s26 = sshll.u32 %s383_s24, 3  ;;  %414 = sbr.rel (%p1393_p0) target bundleno = 38 (0x26), region = 56  ;;  %v416_v1 = vld [vmem:[%s2125_s1] sm:$0xff] (!%p1393_p0)  ;;  %vm418_vm0 = vcmask (!%p1393_p0), 261120  }
  0x20   : > { %s385_s19 = scalar_lea.vmem %s2124_s0, %s1383_s26  ;;  %s1384_s20 = sshll.u32 %s387_s25, 1 }
  0x21   : > { %s1919_s11 = scalar_lea.vmem %s2126_s2, %s1384_s20  ;;  %s1426_s10 = sshll.u32 %s387_s25, 4  ;;  %v415_v0 = vld [vmem:[%s385_s19] sm:$0xff] (!%p1393_p0) }
  0x22   : > { %s394_s18 = scalar_lea.vmem %s2127_s3, %s1426_s10  ;;  %s1927_s12 = scalar_lea.vmem %s2128_s4, %s1426_s10  ;;  %v417_v2 = vadd.f32 (!%p1393_p0), %v416_v1, %v415_v0 }
  0x23   : > { %s1932_s26 = scalar_lea.vmem %s2129_s5, %s1426_s10  ;;  %s1429_s13 = sshll.u32 %s387_s25, 6 }
  0x24   : > { %s1937_s16 = scalar_lea.vmem %s2130_s6, %s1429_s13  ;;  %s1939_s20 = scalar_lea.vmem [#allocation2], %s1382_s23 }
  0x25   : > { %419 = vst.msk [vmem:[%s1939_s20] sm:$0xff] (!%p1393_p0), %vm418_vm0, %v417_v2 }
  0x26 PF: > { %vm450_vm1 = vcmask 261120   ;;  %v1643_v10 = vld [vmem:[%s394_s18] sm:$0xff]   ;;  %v1775_v11 = vmov 0.0   ;;  %vm1776_vm2 = vmmov 0   ;;  %v1644_v12 = vld [vmem:[%s394_s18 + $0x8] sm:$0xff]   ;;  %v465_v13 = vlaneseq  ;;  %s1777_s8 = smov 120  }
  0x27   : > { %1464 = vmatprep.subr.bf16.mxu0 %v1775_v11  ;;  %1468 = vmatprep.mubr.msk.bf16.mxu0 %vm1776_vm2, %v1775_v11  ;;  %v421_v16 = vld [vmem:[%s1919_s11] sm:$0x3]  ;;  %s1778_s10 = smov 96   ;;  %s1779_s11 = smov 88   ;;  %vm530_vm3 = vcmask 64512   ;;  %vm594_vm4 = vcmask 1043456  }
  0x28   : > { %1465 = vmatpush3.bf16.msra.mxu0 %v1643_v10  ;;  %1484 = vmatprep.subr.bf16.mxu1 %v1775_v11  ;;  %v466_v14 = vshrl.u32 %v465_v13, 7  ;;  %s1780_s18 = smov 80   ;;  %s1781_s21 = smov 112   ;;  %vm981_vm5 = vcmask 130048   ;;  %vm983_vm6 = vcmask 195584  }
  0x29   : > { %1466 = vmatprep.subr.bf16.mxu0 %v1775_v11  ;;  %1486 = vmatprep.mubr.msk.bf16.mxu1 %vm1776_vm2, %v1775_v11  ;;  %s1782_s22 = smov 72   ;;  %s1783_s23 = smov 104  }
  0x2a   : > { %v1057_v15 = vsub.s32 1, %v466_v14  ;;  %v467_v21 = vsub.s32 0, %v466_v14  ;;  %s1784_s25 = smov 64   ;;  %s1785_s19 = smov 56  }
  0x2b   : > { %s1786_s24 = smov 48   ;;  %s1787_s13 = smov 40  }
  0x2c   : > { %v1947_v3 = vld [vmem:[%s1939_s20] sm:$0xff]  ;;  %1467 = vmatpush3.bf16.msra.mxu0 %v1644_v12  ;;  %v1962_v17 = vrot.slane %v421_v16, %v1057_v15  ;;  %v468_v22 = vrot.slane %v421_v16, %v467_v21  ;;  %s1788_s14 = smov 8   ;;  %s1789_s15 = smov 16  }
  0x2d   : > { %v451_v4 = vsel %vm450_vm1, %v1947_v3, 0.0  ;;  %1472 = vmatprep.subr.bf16.mxu0 %v1775_v11  ;;  %s1790_s27 = smov 24   ;;  %p1419_p1 = scmp.eq.s32.totalorder %s1757_s30, 1 }
  0x2e   : > { %452 = vadd.xlane.f32.xlu0 %v451_v4 }
  0xbb   : > { %v453_v5 = vpop.xlane.xlu0 %452 }
  0xbc   : > { %v455_v6 = vmul.f32 0.03125, %v453_v5 }
  0xbe   : > { %v456_v7 = vsub.f32 %v1947_v3, %v455_v6 }
  0xc0   : > { %v457_v8 = vmul.f32 %v456_v7, %v456_v7 }
  0xc2   : > { %v458_v9 = vsel %vm450_vm1, %v457_v8, 0.0 }
  0xc3   : > { %459 = vadd.xlane.f32.xlu0 %v458_v9 }
 0x150   : > { %v460_v18 = vpop.xlane.xlu0 %459 }
 0x151   : > { %v461_v19 = vmul.f32 0.03125, %v460_v18 }
 0x153   : > { %v462_v20 = vadd.f32 1e-05, %v461_v19 }
 0x155   : > { %1657 = vrsqrt.f32 %v462_v20 }
 0x15f   : > { %v1658_v23 = vpop.eup %1657 }
 0x160   : > { %v464_v24 = vmul.f32 %v1658_v23, %v456_v7 }
 0x162   : > { %v469_v25 = vmul.f32 %v468_v22, %v464_v24 }
 0x164   : > { %v470_v26 = vpack.c.bf16 %v469_v25, %v469_v25 }
 0x166   : > { %1469 = vmatmul.mubr.msk.bf16.vlgmr.msra.gmra.mrb[0].mxu0 %vm450_vm1, %v470_v26 }
 0x167   : > { %1474 = vmatprep.mubr.msk.bf16.mxu0 %vm1776_vm2, %v1775_v11 }
 0x239   : > { %v520_v27 = vpop.f32.mrb[0].mxu0 }
 0x23a   : > { %v1967_v28 = vpack.c.bf16 %v520_v27, %v520_v27  ;;  %v1470_v29 = vpop.f32.mrb[1].mxu0 }
 0x23b   : > { %v523_v30 = vpop.f32.mrb[2].mxu0 }
 0x23c   : > { %638 = vrot.lane.b32.xlu0 %v1967_v28, %s1777_s8  ;;  %528 = vrot.lane.b32.xlu1 %v1967_v28, %s1778_s10  ;;  %v1471_v31 = vpop.f32.mrb[3].mxu0 }
 0x240   : > { %640 = vrot.lane.b32.xlu1 %v1967_v28, %s1779_s11 }
 0x244   : > { %750 = vrot.lane.b32.xlu1 %v1967_v28, %s1780_s18 }
 0x248   : > { %748 = vrot.lane.b32.xlu1 %v1967_v28, %s1781_s21 }
 0x24c   : > { %860 = vrot.lane.b32.xlu1 %v1967_v28, %s1782_s22 }
 0x250   : > { %858 = vrot.lane.b32.xlu1 %v1967_v28, %s1783_s23 }
 0x2ae   : > { %v529_v32 = vpop.permute.xlu1 %528  ;;  %v639_v37 = vpop.permute.xlu0 %638 }
 0x2af   : > { %v535_v33 = vsel %vm530_vm3, %v529_v32, 0 }
 0x2b0   : > { %1473 = vmatpush3.bf16.xpose.msra.mxu0 %v535_v33 }
 0x2b1   : > { %1478 = vmatprep.subr.bf16.mxu0 %v1775_v11 }
 0x2b2   : > { %v641_v34 = vpop.permute.xlu1 %640 }
 0x2b3   : > { %v646_v35 = vsel %vm530_vm3, %v641_v34, 0 }
 0x2b4   : > { %1485 = vmatpush3.bf16.xpose.msra.mxu1 %v646_v35 }
 0x2b5   : > { %1496 = vmatprep.subr.bf16.mxu1 %v1775_v11 }
 0x2b6   : > { %v751_v36 = vpop.permute.xlu1 %750 }
 0x2b7   : > { %1475 = vmatmul.mubr.msk.bf16.vlgmr.msra.gmra.mrb[4].mxu0 %vm530_vm3, %v1967_v28  ;;  %v756_v39 = vsel %vm530_vm3, %v751_v36, 0 }
 0x2b8   : > { %1480 = vmatprep.mubr.msk.bf16.mxu0 %vm1776_vm2, %v1775_v11 }
 0x2ba   : > { %v749_v38 = vpop.permute.xlu1 %748 }
 0x2bb   : > { %1487 = vmatmul.mubr.msk.bf16.vlgmr.msra.gmra.mrb[0].mxu1 %vm530_vm3, %v639_v37 }
 0x2bc   : > { %1497 = vmatpush3.bf16.xpose.msra.mxu1 %v756_v39  ;;  %1498 = vmatprep.mubr.msk.bf16.mxu1 %vm1776_vm2, %v1775_v11 }
 0x2bd   : > { %1508 = vmatprep.subr.bf16.mxu1 %v1775_v11 }
 0x2be   : > { %v861_v40 = vpop.permute.xlu1 %860 }
 0x2bf   : > { %v866_v41 = vsel %vm530_vm3, %v861_v40, 0 }
 0x2c2   : > { %v859_v42 = vpop.permute.xlu1 %858 }
 0x2c3   : > { %1499 = vmatmul.mubr.msk.bf16.vlgmr.msra.gmra.mrb[4].mxu1 %vm530_vm3, %v749_v38 }
 0x2c4   : > { %1509 = vmatpush3.bf16.xpose.msra.mxu1 %v866_v41  ;;  %1510 = vmatprep.mubr.msk.bf16.mxu1 %vm1776_vm2, %v1775_v11 }
 0x2c5   : > { %1520 = vmatprep.subr.bf16.mxu1 %v1775_v11 }
 0x2cb   : > { %1511 = vmatmul.mubr.msk.bf16.vlgmr.msra.gmra.mrb[8].mxu1 %vm530_vm3, %v859_v42 }
 0x2cc   : > { %1524 = vmatprep.mubr.msk.bf16.mxu1 %vm1776_vm2, %v1775_v11 }
 0x38a   : > { %v571_v43 = vpop.f32.mrb[4].mxu0 }
 0x38b   : > { %v1476_v44 = vpop.f32.mrb[5].mxu0  ;;  %v577_v45 = vsel %vm530_vm3, %v571_v43, -inf }
 0x38c   : > { %578 = vmax.xlane.f32.xlu1 %v577_v45  ;;  %v574_v46 = vpop.f32.mrb[6].mxu0 }
 0x38d   : > { %v1477_v47 = vpop.f32.mrb[7].mxu0 }
 0x38e   : > { %v682_v48 = vpop.f32.mrb[0].mxu1 }
 0x38f   : > { %v1488_v49 = vpop.f32.mrb[1].mxu1  ;;  %v688_v50 = vsel %vm530_vm3, %v682_v48, -inf }
 0x390   : > { %689 = vmax.xlane.f32.xlu0 %v688_v50  ;;  %v685_v51 = vpop.f32.mrb[2].mxu1 }
 0x391   : > { %v1489_v52 = vpop.f32.mrb[3].mxu1 }
 0x396   : > { %v792_v53 = vpop.f32.mrb[4].mxu1 }
 0x397   : > { %v1500_v54 = vpop.f32.mrb[5].mxu1  ;;  %v798_v55 = vsel %vm530_vm3, %v792_v53, -inf }
 0x398   : > { %v795_v56 = vpop.f32.mrb[6].mxu1  ;;  %799 = vmax.xlane.f32.xlu1 %v798_v55  ;;  %v1645_v54 = vld [vmem:[%s1927_s12] sm:$0xff]   ;;  %v1646_v55 = vld [vmem:[%s1927_s12 + $0x8] sm:$0xff]  }
 0x399   : > { %v1501_v57 = vpop.f32.mrb[7].mxu1  ;;  %1521 = vmatpush3.bf16.msra.mxu1 %v1645_v54 }
 0x39a   : > { %1522 = vmatprep.subr.bf16.mxu1 %v1775_v11 }
 0x39d   : > { %1523 = vmatpush3.bf16.msra.mxu1 %v1646_v55 }
 0x39e   : > { %v902_v58 = vpop.f32.mrb[8].mxu1  ;;  %1536 = vmatprep.subr.bf16.mxu1 %v1775_v11 }
 0x39f   : > { %v1512_v59 = vpop.f32.mrb[9].mxu1  ;;  %v908_v60 = vsel %vm530_vm3, %v902_v58, -inf }
 0x3a0   : > { %909 = vmax.xlane.f32.xlu0 %v908_v60  ;;  %v905_v61 = vpop.f32.mrb[10].mxu1 }
 0x3a1   : > { %v1513_v62 = vpop.f32.mrb[11].mxu1 }
 0x419   : > { %v579_v63 = vpop.xlane.xlu1 %578 }
 0x41a   : > { %v580_v0 = vsub.f32 %v571_v43, %v579_v63 }
 0x41c   : > { %v581_v1 = vmul.f32 1.442695, %v580_v0 }
 0x41d   : > { %v690_v2 = vpop.xlane.xlu0 %689 }
 0x41e   : > { %1659 = vpow2.f32 %v581_v1  ;;  %v691_v4 = vsub.f32 %v682_v48, %v690_v2 }
 0x420   : > { %v692_v5 = vmul.f32 1.442695, %v691_v4 }
 0x422   : > { %1661 = vpow2.f32 %v692_v5 }
 0x425   : > { %v800_v16 = vpop.xlane.xlu1 %799 }
 0x426   : > { %v801_v18 = vsub.f32 %v792_v53, %v800_v16 }
 0x428   : > { %v1660_v6 = vpop.eup %1659  ;;  %v802_v19 = vmul.f32 1.442695, %v801_v18 }
 0x429   : > { %v583_v7 = vsel %vm530_vm3, %v1660_v6, 0.0 }
 0x42a   : > { %584 = vadd.xlane.f32.xlu1 %v583_v7 }
 0x42c   : > { %v1662_v8 = vpop.eup %1661 }
 0x42d   : > { %v910_v9 = vpop.xlane.xlu0 %909  ;;  %v694_v10 = vsel %vm530_vm3, %v1662_v8, 0.0 }
 0x42e   : > { %v911_v12 = vsub.f32 %v902_v58, %v910_v9  ;;  %695 = vadd.xlane.f32.xlu0 %v694_v10 }
 0x430   : > { %v912_v13 = vmul.f32 1.442695, %v911_v12 }
 0x432   : > { %1663 = vpow2.f32 %v912_v13 }
 0x433   : > { %1665 = vpow2.f32 %v802_v19 }
 0x43b   : > { %589 = vrot.lane.b32.xlu1 %v1967_v28, %s1784_s25 }
 0x43c   : > { %v1664_v14 = vpop.eup %1663 }
 0x43d   : > { %v914_v15 = vsel %vm530_vm3, %v1664_v14, 0.0  ;;  %v1666_v20 = vpop.eup %1665 }
 0x43e   : > { %915 = vadd.xlane.f32.xlu0 %v914_v15  ;;  %v804_v21 = vsel %vm530_vm3, %v1666_v20, 0.0 }
 0x454   : > { %700 = vrot.lane.b32.xlu0 %v1967_v28, %s1785_s19 }
 0x45f   : > { %805 = vadd.xlane.f32.xlu1 %v804_v21  ;;  %v1647_v21 = vld [vmem:[%s1932_s26] sm:$0xff]  }
 0x470   : > { %810 = vrot.lane.b32.xlu1 %v1967_v28, %s1786_s24 }
 0x474   : > { %920 = vrot.lane.b32.xlu1 %v1967_v28, %s1787_s13 }
 0x4b7   : > { %v585_v22 = vpop.xlane.xlu1 %584 }
 0x4b8   : > { %1667 = vrcp.f32 %v585_v22  ;;  %v1649_v22 = vld [vmem:[%s1937_s16] sm:$0xff]  }
 0x4bb   : > { %v590_v23 = vpop.permute.xlu1 %589  ;;  %v696_v25 = vpop.xlane.xlu0 %695 }
 0x4bc   : > { %v596_v24 = vsel %vm594_vm4, %v590_v23, 0  ;;  %1669 = vrcp.f32 %v696_v25  ;;  %v1650_v23 = vld [vmem:[%s1937_s16 + $0x8] sm:$0xff]   ;;  %v1652_v25 = vld [vmem:[%s1937_s16 + $0x18] sm:$0xff]  }
 0x4bd   : > { %1479 = vmatpush3.bf16.msra.mxu0 %v596_v24  ;;  %v1651_v24 = vld [vmem:[%s1937_s16 + $0x10] sm:$0xff]  }
 0x4be   : > { %1490 = vmatprep.subr.bf16.mxu0 %v1775_v11 }
 0x4c2   : > { %v1668_v26 = vpop.eup %1667 }
 0x4c3   : > { %v587_v27 = vmul.f32 %v1668_v26, %v1660_v6  ;;  %v1653_v26 = vld [vmem:[%s1937_s16 + $0x20] sm:$0xff]  }
 0x4c5   : > { %v588_v29 = vpack.c.bf16 %v587_v27, %v587_v27  ;;  %v1654_v27 = vld [vmem:[%s1937_s16 + $0x28] sm:$0xff]  }
 0x4c6   : > { %v1670_v28 = vpop.eup %1669 }
 0x4c7   : > { %1481 = vmatmul.mubr.msk.bf16.vlgmr.msra.gmra.mrb[8].mxu0 %vm530_vm3, %v588_v29  ;;  %v698_v31 = vmul.f32 %v1670_v28, %v1662_v8  ;;  %v1655_v29 = vld [vmem:[%s1937_s16 + $0x30] sm:$0xff]  }
 0x4c8   : > { %1492 = vmatprep.mubr.msk.bf16.mxu0 %vm1776_vm2, %v1775_v11 }
 0x4c9   : > { %v699_v34 = vpack.c.bf16 %v698_v31, %v698_v31 }
 0x4cb   : > { %v916_v30 = vpop.xlane.xlu0 %915 }
 0x4cf   : > { %v701_v32 = vpop.permute.xlu0 %700 }
 0x4d0   : > { %v706_v33 = vsel %vm594_vm4, %v701_v32, 0 }
 0x4d1   : > { %1491 = vmatpush3.bf16.msra.mxu0 %v706_v33 }
 0x4d2   : > { %1502 = vmatprep.subr.bf16.mxu0 %v1775_v11 }
 0x4d4   : > { %1493 = vmatmul.mubr.msk.bf16.vlgmr.msra.gmra.mrb[12].mxu0 %vm530_vm3, %v699_v34 }
 0x4d5   : > { %1504 = vmatprep.mubr.msk.bf16.mxu0 %vm1776_vm2, %v1775_v11 }
 0x4ec   : > { %v806_v35 = vpop.xlane.xlu1 %805 }
 0x4ed   : > { %1671 = vrcp.f32 %v806_v35 }
 0x4ee   : > { %1673 = vrcp.f32 %v916_v30 }
 0x4f0   : > { %v811_v36 = vpop.permute.xlu1 %810 }
 0x4f1   : > { %v816_v37 = vsel %vm594_vm4, %v811_v36, 0  ;;  %v1656_v36 = vld [vmem:[%s1937_s16 + $0x38] sm:$0xff]  }
 0x4f2   : > { %1503 = vmatpush3.bf16.msra.mxu0 %v816_v37 }
 0x4f3   : > { %1514 = vmatprep.subr.bf16.mxu0 %v1775_v11 }
 0x4f4   : > { %v921_v40 = vpop.permute.xlu1 %920 }
 0x4f5   : > { %v926_v43 = vsel %vm594_vm4, %v921_v40, 0 }
 0x4f7   : > { %v1672_v38 = vpop.eup %1671 }
 0x4f8   : > { %v808_v39 = vmul.f32 %v1672_v38, %v1666_v20  ;;  %v1674_v42 = vpop.eup %1673 }
 0x4f9   : > { %v918_v44 = vmul.f32 %v1674_v42, %v1664_v14 }
 0x4fa   : > { %v809_v41 = vpack.c.bf16 %v808_v39, %v808_v39 }
 0x4fb   : > { %v919_v45 = vpack.c.bf16 %v918_v44, %v918_v44 }
 0x4fc   : > { %1505 = vmatmul.mubr.msk.bf16.vlgmr.msra.gmra.mrb[16].mxu0 %vm530_vm3, %v809_v41 }
 0x4fd   : > { %1515 = vmatpush3.bf16.msra.mxu0 %v926_v43  ;;  %1516 = vmatprep.mubr.msk.bf16.mxu0 %vm1776_vm2, %v1775_v11 }
 0x4fe   : > { %1528 = vmatprep.subr.bf16.mxu0 %v1775_v11 }
 0x504   : > { %1517 = vmatmul.mubr.msk.bf16.vlgmr.msra.gmra.mrb[20].mxu0 %vm530_vm3, %v919_v45 }
 0x505   : > { %1532 = vmatprep.mubr.msk.bf16.mxu0 %vm1776_vm2, %v1775_v11  ;;  %1529 = vmatpush3.bf16.msra.mxu0 %v1647_v21 }
 0x506   : > { %1530 = vmatprep.subr.bf16.mxu0 %v1775_v11 }
 0x59a   : > { %v632_v46 = vpop.f32.mrb[8].mxu0 }
 0x59b   : > { %v1482_v47 = vpop.f32.mrb[9].mxu0 }
 0x59c   : > { %v635_v48 = vpop.f32.mrb[10].mxu0 }
 0x59d   : > { %v1483_v49 = vpop.f32.mrb[11].mxu0 }
 0x5a7   : > { %v742_v50 = vpop.f32.mrb[12].mxu0 }
 0x5a8   : > { %969 = vrot.lane.b32.xlu0 %v742_v50, %s1788_s14  ;;  %v1494_v51 = vpop.f32.mrb[13].mxu0 }
 0x5a9   : > { %v745_v52 = vpop.f32.mrb[14].mxu0 }
 0x5aa   : > { %v1495_v53 = vpop.f32.mrb[15].mxu0 }
 0x5cf   : > { %v852_v56 = vpop.f32.mrb[16].mxu0 }
 0x5d0   : > { %973 = vrot.lane.b32.xlu1 %v852_v56, %s1789_s15  ;;  %v1506_v57 = vpop.f32.mrb[17].mxu0 }
 0x5d1   : > { %v855_v58 = vpop.f32.mrb[18].mxu0 }
 0x5d2   : > { %v1507_v59 = vpop.f32.mrb[19].mxu0 }
 0x5d7   : > { %v962_v60 = vpop.f32.mrb[20].mxu0 }
 0x5d8   : > { %977 = vrot.lane.b32.xlu0 %v962_v60, %s1790_s27  ;;  %v1518_v61 = vpop.f32.mrb[21].mxu0 }
 0x5d9   : > { %v965_v62 = vpop.f32.mrb[22].mxu0 }
 0x5da   : > { %v1519_v63 = vpop.f32.mrb[23].mxu0 }
 0x61a   : > { %v970_v0 = vpop.permute.xlu0 %969 }
 0x61b   : > { %v980_v2 = vsel %vm530_vm3, %v632_v46, %v970_v0 }
 0x642   : > { %v974_v1 = vpop.permute.xlu1 %973 }
 0x643   : > { %v982_v4 = vsel %vm981_vm5, %v980_v2, %v974_v1 }
 0x64a   : > { %v978_v5 = vpop.permute.xlu0 %977 }
 0x64b   : > { %v984_v6 = vsel %vm983_vm6, %v982_v4, %v978_v5 }
 0x64c   : > { %v985_v7 = vpack.c.bf16 %v984_v6, %v984_v6 }
 0x64e   : > { %1525 = vmatmul.mubr.msk.bf16.vlgmr.msra.gmra.mrb[12].mxu1 %vm450_vm1, %v985_v7 }
 0x64f   : > { %1552 = vmatprep.mubr.msk.bf16.mxu1 %vm1776_vm2, %v1775_v11  ;;  %1537 = vmatpush3.bf16.msra.mxu1 %v1649_v22 }
 0x650   : > { %1538 = vmatprep.subr.bf16.mxu1 %v1775_v11 }
 0x653   : > { %1539 = vmatpush3.bf16.msra.mxu1 %v1650_v23 }
 0x654   : > { %1540 = vmatprep.subr.bf16.mxu1 %v1775_v11 }
 0x657   : > { %1541 = vmatpush3.bf16.msra.mxu1 %v1651_v24 }
 0x658   : > { %1542 = vmatprep.subr.bf16.mxu1 %v1775_v11 }
 0x65b   : > { %1543 = vmatpush3.bf16.msra.mxu1 %v1652_v25 }
 0x65c   : > { %1544 = vmatprep.subr.bf16.mxu1 %v1775_v11 }
 0x65f   : > { %1545 = vmatpush3.bf16.msra.mxu1 %v1653_v26 }
 0x660   : > { %1546 = vmatprep.subr.bf16.mxu1 %v1775_v11 }
 0x663   : > { %1547 = vmatpush3.bf16.msra.mxu1 %v1654_v27 }
 0x664   : > { %1548 = vmatprep.subr.bf16.mxu1 %v1775_v11 }
 0x667   : > { %1549 = vmatpush3.bf16.msra.mxu1 %v1655_v29 }
 0x668   : > { %1550 = vmatprep.subr.bf16.mxu1 %v1775_v11 }
 0x66b   : > { %1551 = vmatpush3.bf16.msra.mxu1 %v1656_v36 }
 0x721   : > { %v1035_v8 = vpop.f32.mrb[12].mxu1 }
 0x722   : > { %v1041_v9 = vadd.f32 %v1035_v8, %v1947_v3  ;;  %v1526_v10 = vpop.f32.mrb[13].mxu1  ;;  %v1648_v3 = vld [vmem:[%s1932_s26 + $0x8] sm:$0xff]  }
 0x723   : > { %v1038_v12 = vpop.f32.mrb[14].mxu1  ;;  %1531 = vmatpush3.bf16.msra.mxu0 %v1648_v3 }
 0x724   : > { %v1527_v13 = vpop.f32.mrb[15].mxu1  ;;  %v1042_v14 = vsel %vm450_vm1, %v1041_v9, 0.0 }
 0x725   : > { %1043 = vadd.xlane.f32.xlu1 %v1042_v14 }
 0x7b2   : > { %v1044_v15 = vpop.xlane.xlu1 %1043 }
 0x7b3   : > { %v1045_v16 = vmul.f32 0.03125, %v1044_v15 }
 0x7b5   : > { %v1046_v18 = vsub.f32 %v1041_v9, %v1045_v16 }
 0x7b7   : > { %v1047_v19 = vmul.f32 %v1046_v18, %v1046_v18 }
 0x7b9   : > { %v1048_v20 = vsel %vm450_vm1, %v1047_v19, 0.0 }
 0x7ba   : > { %1049 = vadd.xlane.f32.xlu0 %v1048_v20 }
 0x847   : > { %v1050_v28 = vpop.xlane.xlu0 %1049 }
 0x848   : > { %v1051_v30 = vmul.f32 0.03125, %v1050_v28 }
 0x84a   : > { %v1052_v31 = vadd.f32 1e-05, %v1051_v30 }
 0x84c   : > { %1675 = vrsqrt.f32 %v1052_v31 }
 0x856   : > { %v1676_v32 = vpop.eup %1675 }
 0x857   : > { %v1054_v33 = vmul.f32 %v1676_v32, %v1046_v18 }
 0x859   : > { %v1059_v34 = vmul.f32 %v1962_v17, %v1054_v33 }
 0x85b   : > { %v1060_v35 = vpack.c.bf16 %v1059_v34, %v1059_v34 }
 0x85d   : > { %1533 = vmatmul.mubr.msk.bf16.vlgmr.msra.gmra.mrb[24].mxu0 %vm450_vm1, %v1060_v35 }
 0x930   : > { %v1110_v37 = vpop.f32.mrb[24].mxu0 }
 0x931   : > { %v1116_v38 = vmax.f32 %v1110_v37, 0.0  ;;  %v1534_v39 = vpop.f32.mrb[25].mxu0 }
 0x932   : > { %v1113_v40 = vpop.f32.mrb[26].mxu0 }
 0x933   : > { %v1117_v41 = vpack.c.bf16 %v1116_v38, %v1116_v38  ;;  %v1535_v42 = vpop.f32.mrb[27].mxu0 }
 0x935   : > { %1553 = vmatmul.mubr.bf16.vlgmr.msra.gmra.mrb[16].mxu1 %v1117_v41 }
 0xa05   : > { %1211 = sbr.rel (%p1419_p1) target bundleno = 2572 (0xa0c), region = 60 }
 0xa08   : > { %v1200_v11 = vpop.f32.mrb[16].mxu1 }
 0xa09   : > { %v1206_v43 = vadd.f32 %v1200_v11, %v1041_v9  ;;  %v1554_v44 = vpop.f32.mrb[17].mxu1 }
 0xa0a   : > { %v1203_v45 = vpop.f32.mrb[18].mxu1 }
 0xa0b   : > { %v1555_v46 = vpop.f32.mrb[19].mxu1  ;;  %1212 = vst.msk [vmem:[%s1939_s20] sm:$0xff] (!%p1419_p1), %vm450_vm1, %v1206_v43 }
 0xa0c PF: > { %p1420_p2 = scmp.ne.s32.totalorder %s1757_s30, 1 }
 0xa0d   : > { %v1217_v17 = vmul.f32 (!%p1420_p2), %v1206_v43, %v1206_v43  ;;  %v1421_v52 = vld [vmem:[%s2131_s7] ss:$0 sm:$0xff] (!%p1420_p2) }
 0xa0e   : > { %1215 = sbr.rel (%p1420_p2) target bundleno = 2738 (0xab2), region = 64 }
 0xa0f   : > { %v1218_v47 = vsel (!%p1420_p2), %vm450_vm1, %v1217_v17, 0.0 }
 0xa10   : > { %1219 = vadd.xlane.f32.xlu0 (!%p1420_p2), %v1218_v47 }
 0xa9d   : > { %v1220_v48 = vpop.xlane.xlu0 %1219 }
 0xa9e   : > { %v1221_v49 = vmul.f32 0.03125, %v1220_v48 }
 0xaa0   : > { %v1222_v50 = vadd.f32 1.1920929e-07, %v1221_v49 }
 0xaa2   : > { %1677 = vrsqrt.f32 %v1222_v50 }
 0xaac   : > { %v1678_v51 = vpop.eup %1677 }
 0xaad   : > { %v1224_v53 = vmul.f32 %v1678_v51, %v1206_v43 }
 0xaaf   : > { %v1231_v54 = vmul.f32 %v1421_v52, %v1224_v53 }
 0xab1   : > { %1232 = vst.msk [vmem:[%s1939_s20] sm:$0xff] %vm450_vm1, %v1231_v54 }
 0xab2 PF: > { %s1423_s30 = sshll.u32 %s1761_s9, 7  ;;  %s2155_s8 = sld [smem:[#allocation14_spill]] }
 0xab3   : > { %s1247_s11 = sshll.u32 %s1939_s20, 4  ;;  %s2156_s18 = sand.u32 1, %s1749_s28   ;;  %s1248_s11 = int_to_ptr.vmem [resolvable:$true] %s1247_s11 }
 0xab4   : > { %s1234_s21 = scalar_lea.sflag [#allocation3], %s2156_s18  ;;  %s1679_s22 = scalar_lea.vmem %s1248_s11, 128 }
 0xab5   : > { %p1680_p4 = scmp.ne.s32.totalorder %s1248_s11, %s1679_s22  ;;  %s1791_s23 = smov [#allocation2]  }
 0xab6   : > { %s1683_s25 = sshll.u32 %s1791_s23, 4  ;;  %s1684_s25 = int_to_ptr.vmem [resolvable:$false] %s1683_s25 }
 0xab7   : > { %p1681_p5 = pnand %p1680_p4, %p1886_p3  ;;  %s1685_s19 = scalar_lea.vmem %s1684_s25, 256 }
 0xab8   : > { %s2074_s10 = scalar_lea.hbm %s2155_s8, %s1423_s30  ;;  %p1686_p7 = scmp.lt.s32.totalorder %s1248_s11, %s1684_s25 }
 0xab9   : > { %p1682_p6 = pneg %p1681_p5  ;;  %p1687_p8 = scmp.lt.s32.totalorder %s1685_s19, %s1679_s22 }
 0xabb   : > { %p1688_p10 = por %p1687_p8, %p1686_p7 }
 0xabd   : > { %p1689_p11 = pnand %p1688_p10, %p1682_p6 }
 0xabf   : > { %1692 = shalt.err (!%p1689_p11)
}
 0xac0   : > { %s1693_s9 = scalar_lea.hbm %s2074_s10, 128  ;;  %s1697_s13 = scalar_lea.hbm %s2155_s8, 256 }
 0xac1   : > { %p1694_p12 = scmp.ne.s32.totalorder %s2074_s10, %s1693_s9  ;;  %p1698_p1 = scmp.lt.u32.totalorder %s2074_s10, %s2155_s8 }
 0xac2   : > { %p1699_p2 = scmp.lt.u32.totalorder %s1697_s13, %s1693_s9  ;;  %p1701_p5 = scmp.lt.u32.totalorder %s1693_s9, %s2074_s10 }
 0xac3   : > { %p1695_p13 = pnand %p1694_p12, %p1886_p3 }
 0xac4   : > { %p1700_p4 = por %p1699_p2, %p1698_p1 }
 0xac5   : > { %p1696_p0 = pneg %p1695_p13 }
 0xac6   : > { %p1702_p6 = por %p1701_p5, %p1700_p4 }
 0xac8   : > { %p1703_p7 = pnand %p1702_p6, %p1696_p0 }
 0xaca   : > { %1706 = shalt.err (!%p1703_p7)
}
 0xacb   : > { %1556 = dma.vmem_to_hbm [thread:$0]  (%p1886_p3), %s1248_s11, 128, %s2074_s10, %s1234_s21  }
 0xacc PF: > { %s2157_s27 = sld [smem:[#allocation9_spill]]  ;;  %s2158_s12 = sld [smem:[#allocation5_spill]] }
 0xad2   : > { %p1562_p8 = scmp.ge.s32.totalorder %s2157_s27, 2  ;;  %s1259_s30 = sand.u32 1, %s2158_s12  }
 0xad3   : > { %s1260_s16 = scalar_lea.sflag [#allocation3], %s1259_s30 }
 0xad4   : > { %p1559_p10 = pnand %p1562_p8, %p1896_p9 }
 0xad6   : > { %1740 = dma.done.wait (!%p1559_p10), %s1260_s16, 128  }
 0xad7   : > { %1742 = vsyncadd (!%p1559_p10), %s1260_s16, 4294967168  ;;  %s21_s12 = sadd.s32 1, %s2157_s27   ;;  %s2160_s29 = sld [smem:[#allocation6_spill]] }
 0xad8   : > { %p18_p11 = scmp.ge.s32.totalorder %s21_s12, 10   ;;  %s2161_s18 = sld [smem:[#allocation13_spill]] }
 0xad9   : > { %s2162_s30 = sld [smem:[#allocation7_spill]]  ;;  %s2163_s9 = sld [smem:[#allocation8_spill]] }
 0xada   : > { %s2164_s10 = sld [smem:[#allocation10_spill]]  ;;  %s2165_s11 = sld [smem:[#allocation11_spill]] }
 0xadb   : > { %s2166_s27 = smov %s1749_s28  ;;  %20 = sbr.rel (!%p18_p11) target bundleno = 7 (0x7), region = 114 }
 0xadd   : > { %s2167_s28 = smov %s2160_s29 }
 0xade   : > { %s2168_s29 = smov %s2161_s18 }
 0xae2   :  { %1265 = vsyncpa [#allocation3], 1 }
 0xae3   :  { %1267 = vsyncpa [#allocation3 + $0x1], 1 }

</bundles_post_ra>
